<compile_context>
chip_gen: v6e
topology: v6e:2x2x1
jax: 0.10.0
libtpu: 0.0.40
codegen_flags: <defaults>
</compile_context>

<pallas_src>
import functools

import jax
import jax.numpy as jnp
from jax.experimental import pallas as pl
from jax.experimental.pallas import tpu as pltpu

EPS = 1e-8


def _cond_instance_norm_kernel(len_ref, x_ref, cmean_ref, cstd_ref, out_ref, *, eps):
    # len_ref   : (B,) int32 in SMEM (scalar-prefetched valid lengths)
    # x_ref     : (L, tE) float32
    # cmean_ref : (1, tE) float32   conditioning mean
    # cstd_ref  : (1, tE) float32   conditioning std
    # out_ref   : (L, tE) float32
    b = pl.program_id(0)
    L, tE = x_ref.shape

    x = x_ref[...]                                   # (L, tE)
    length_i = len_ref[b]                            # int32 scalar
    inv_len = 1.0 / length_i.astype(jnp.float32)     # one scalar divide

    # Like the PyTorch code, the sums run over ALL L positions (padded rows
    # included in the numerator); only the divisor uses the valid length.
    mean = jnp.sum(x, axis=0, keepdims=True) * inv_len          # (1, tE)
    centered = x - mean                                          # (L, tE)
    var = jnp.sum(centered * centered, axis=0, keepdims=True) * inv_len
    inv_std = 1.0 / jnp.sqrt(var + eps)                          # (1, tE), exact

    normed = centered * inv_std                                  # multiplies only
    scaled = cstd_ref[...] * normed + cmean_ref[...]             # (L, tE)

    # Rebuild the pad mask in-kernel (assumes trailing padding).
    row = jax.lax.broadcasted_iota(jnp.int32, (L, tE), 0)
    pad = row >= length_i
    out_ref[...] = jnp.where(pad, 0.0, scaled)


def _choose_e_tile(L, E, bytes_per_elem=4, per_buffer_budget=4 * 1024 * 1024):
    """Pick an E tile: a multiple of 128 dividing E, sized so each (L, tE)
    buffer stays ~<= 4 MiB (safe for v5e/v6e/v7x default scoped VMEM with
    double-buffered in + out)."""
    if E <= 128 or E % 128 != 0:
        return E  # full-dim block always satisfies the (8, 128) tiling rule
    max_te = max(128, (per_buffer_budget // (L * bytes_per_elem)) // 128 * 128)
    te = min(E, max_te)
    te = (te // 128) * 128
    while te > 128 and E % te != 0:
        te -= 128
    return te if te >= 128 and E % te == 0 else E


def conditional_instance_norm(inputs, cond_mean, cond_std, padding_mask, eps=EPS):
    """inputs: (B, L, E) f32, cond_mean/cond_std: (B, 1, E) f32,
    padding_mask: (B, L) bool (True = padded).  Returns scaled: (B, L, E) f32."""
    B, L, E = inputs.shape
    inputs = inputs.astype(jnp.float32)
    cond_mean = cond_mean.astype(jnp.float32).reshape(B, 1, E)
    cond_std = cond_std.astype(jnp.float32).reshape(B, 1, E)

    # Per-batch valid lengths (int32) — scalar-prefetched into SMEM.
    lengths = jnp.sum(jnp.logical_not(padding_mask), axis=1).astype(jnp.int32)

    tE = _choose_e_tile(L, E)
    grid = (B, E // tE)

    kernel = functools.partial(_cond_instance_norm_kernel, eps=eps)

    scaled = pl.pallas_call(
        kernel,
        out_shape=jax.ShapeDtypeStruct((B, L, E), jnp.float32),
        grid_spec=pltpu.PrefetchScalarGridSpec(
            num_scalar_prefetch=1,
            grid=grid,
            in_specs=[
                pl.BlockSpec((pl.Squeezed(), L, tE), lambda b, e, lens: (b, 0, e)),
                pl.BlockSpec((pl.Squeezed(), 1, tE), lambda b, e, lens: (b, 0, e)),
                pl.BlockSpec((pl.Squeezed(), 1, tE), lambda b, e, lens: (b, 0, e)),
            ],
            out_specs=pl.BlockSpec(
                (pl.Squeezed(), L, tE), lambda b, e, lens: (b, 0, e)
            ),
        ),
        compiler_params=pltpu.CompilerParams(
            dimension_semantics=("parallel", "parallel"),
        ),
    )(lengths, inputs, cond_mean, cond_std)

    return scaled


def _reference(inputs, cond_mean, cond_std, padding_mask, eps=EPS):
    """Plain-JAX replica of the PyTorch ConditionalInstanceNorm forward."""
    length = jnp.sum(~padding_mask, axis=1, keepdims=True)[:, :, None].astype(
        jnp.float32
    )                                                            # (B,1,1)
    mean = jnp.sum(inputs, axis=1, keepdims=True) / length       # (B,1,E)
    var = jnp.sum((inputs - mean) ** 2, axis=1, keepdims=True) / length
    std = jnp.sqrt(var + eps)
    normed = (inputs - mean) / std
    normed = jnp.where(padding_mask[:, :, None], 0.0, normed)
    scaled = cond_std * normed + cond_mean
    scaled = jnp.where(padding_mask[:, :, None], 0.0, scaled)
    return scaled


if __name__ == "__main__":
    key = jax.random.PRNGKey(0)
    B, L, E = 2, 8, 32

    k_x, k_m, k_s = jax.random.split(key, 3)
    x = jax.random.normal(k_x, (B, L, E), dtype=jnp.float32)
    cond_mean = jax.random.normal(k_m, (B, 1, E), dtype=jnp.float32)
    cond_std = jnp.abs(jax.random.normal(k_s, (B, 1, E), dtype=jnp.float32)) + 0.5

    # deterministic trailing padding: last 2 positions of batch 0, last 3 of batch 1
    valid_lens = jnp.array([L - 2, L - 3], dtype=jnp.int32)
    pos = jnp.arange(L)[None, :]
    padding_mask = pos >= valid_lens[:, None]          # (B, L) bool, True = pad

    scaled = conditional_instance_norm(x, cond_mean, cond_std, padding_mask)
    jax.block_until_ready(scaled)

    ref = _reference(x, cond_mean, cond_std, padding_mask)
    assert jnp.allclose(scaled, ref, atol=1e-5, rtol=1e-5)

    print("KERNEL_OK")
</pallas_src>

<mosaic_0001>
module attributes {stable_mosaic.version = 11 : i64} {
  func.func @_cond_instance_norm_kernel(%arg0: i32, %arg1: i32, %arg2: memref<2xi32, #tpu.memory_space<smem>>, %arg3: memref<1x8x32xf32, #tpu.memory_space<vmem>>, %arg4: memref<1x1x32xf32, #tpu.memory_space<vmem>>, %arg5: memref<1x1x32xf32, #tpu.memory_space<vmem>>, %arg6: memref<1x8x32xf32, #tpu.memory_space<vmem>>) attributes {dimension_semantics = [#tpu.dimension_semantics<parallel>, #tpu.dimension_semantics<parallel>], iteration_bounds = array<i64: 2, 1>, scalar_prefetch = 1 : i64, scratch_operands = 0 : i64, tpu.core_type = #tpu.core_type<tc>, window_params = [{transform_indices = @transform_0, window_bounds = array<i64: 1, 8, 32>}, {transform_indices = @transform_1, window_bounds = array<i64: 1, 1, 32>}, {transform_indices = @transform_2, window_bounds = array<i64: 1, 1, 32>}, {transform_indices = @transform_3, window_bounds = array<i64: 1, 8, 32>}]} {
    %c0 = arith.constant 0 : index
    %c0_0 = arith.constant 0 : index
    %c0_1 = arith.constant 0 : index
    %0 = vector.load %arg3[%c0, %c0_0, %c0_1] : memref<1x8x32xf32, #tpu.memory_space<vmem>>, vector<1x8x32xf32>
    %1 = vector.shape_cast %0 : vector<1x8x32xf32> to vector<8x32xf32>
    %2 = arith.index_cast %arg0 : i32 to index
    %3 = memref.load %arg2[%2] : memref<2xi32, #tpu.memory_space<smem>>
    %4 = arith.sitofp %3 : i32 to f32
    %cst = arith.constant 1.000000e+00 : f32
    %5 = arith.divf %cst, %4 : f32
    %cst_2 = arith.constant dense<0.000000e+00> : vector<32xf32>
    %6 = vector.multi_reduction <add>, %1, %cst_2 [0] : vector<8x32xf32> to vector<32xf32>
    %7 = vector.shape_cast %6 : vector<32xf32> to vector<1x32xf32>
    %8 = vector.broadcast %5 : f32 to vector<1x32xf32>
    %9 = arith.mulf %7, %8 : vector<1x32xf32>
    %10 = vector.broadcast %9 : vector<1x32xf32> to vector<8x32xf32>
    %11 = arith.subf %1, %10 : vector<8x32xf32>
    %12 = arith.mulf %11, %11 : vector<8x32xf32>
    %cst_3 = arith.constant dense<0.000000e+00> : vector<32xf32>
    %13 = vector.multi_reduction <add>, %12, %cst_3 [0] : vector<8x32xf32> to vector<32xf32>
    %14 = vector.shape_cast %13 : vector<32xf32> to vector<1x32xf32>
    %15 = vector.broadcast %5 : f32 to vector<1x32xf32>
    %16 = arith.mulf %14, %15 : vector<1x32xf32>
    %cst_4 = arith.constant 9.99999993E-9 : f32
    %17 = vector.broadcast %cst_4 : f32 to vector<1x32xf32>
    %18 = arith.addf %16, %17 : vector<1x32xf32>
    %19 = math.sqrt %18 : vector<1x32xf32>
    %cst_5 = arith.constant 1.000000e+00 : f32
    %20 = vector.broadcast %cst_5 : f32 to vector<1x32xf32>
    %21 = arith.divf %20, %19 : vector<1x32xf32>
    %22 = vector.broadcast %21 : vector<1x32xf32> to vector<8x32xf32>
    %23 = arith.mulf %11, %22 : vector<8x32xf32>
    %c0_6 = arith.constant 0 : index
    %c0_7 = arith.constant 0 : index
    %c0_8 = arith.constant 0 : index
    %24 = vector.load %arg5[%c0_6, %c0_7, %c0_8] : memref<1x1x32xf32, #tpu.memory_space<vmem>>, vector<1x1x32xf32>
    %25 = vector.shape_cast %24 : vector<1x1x32xf32> to vector<1x32xf32>
    %26 = vector.broadcast %25 : vector<1x32xf32> to vector<8x32xf32>
    %27 = arith.mulf %26, %23 : vector<8x32xf32>
    %c0_9 = arith.constant 0 : index
    %c0_10 = arith.constant 0 : index
    %c0_11 = arith.constant 0 : index
    %28 = vector.load %arg4[%c0_9, %c0_10, %c0_11] : memref<1x1x32xf32, #tpu.memory_space<vmem>>, vector<1x1x32xf32>
    %29 = vector.shape_cast %28 : vector<1x1x32xf32> to vector<1x32xf32>
    %30 = vector.broadcast %29 : vector<1x32xf32> to vector<8x32xf32>
    %31 = arith.addf %27, %30 : vector<8x32xf32>
    %32 = tpu.iota {dimensions = array<i32: 0>} : vector<8x32xi32>
    %33 = vector.broadcast %3 : i32 to vector<8x32xi32>
    %34 = arith.cmpi sge, %32, %33 : vector<8x32xi32>
    %cst_12 = arith.constant 0.000000e+00 : f32
    %35 = vector.broadcast %cst_12 : f32 to vector<8x32xf32>
    %36 = arith.select %34, %35, %31 : vector<8x32xi1>, vector<8x32xf32>
    %c0_13 = arith.constant 0 : index
    %c0_14 = arith.constant 0 : index
    %c0_15 = arith.constant 0 : index
    %37 = vector.load %arg6[%c0_13, %c0_14, %c0_15] : memref<1x8x32xf32, #tpu.memory_space<vmem>>, vector<1x8x32xf32>
    %38 = vector.shape_cast %37 : vector<1x8x32xf32> to vector<8x32xf32>
    %39 = vector.shape_cast %36 : vector<8x32xf32> to vector<1x8x32xf32>
    tpu.vector_store %arg6[%c0_13, %c0_14, %c0_15], %39 {strides = array<i32>} : memref<1x8x32xf32, #tpu.memory_space<vmem>>, vector<1x8x32xf32>,
    return
  }
  func.func @transform_0(%arg0: i32, %arg1: i32, %arg2: memref<2xi32, #tpu.memory_space<smem>>) -> (i32, i32, i32) {
    %c0_i32 = arith.constant 0 : i32
    %c0_i32_0 = arith.constant 0 : i32
    return %arg0, %c0_i32, %arg1 : i32, i32, i32
  }
  func.func @transform_1(%arg0: i32, %arg1: i32, %arg2: memref<2xi32, #tpu.memory_space<smem>>) -> (i32, i32, i32) {
    %c0_i32 = arith.constant 0 : i32
    %c0_i32_0 = arith.constant 0 : i32
    return %arg0, %c0_i32, %arg1 : i32, i32, i32
  }
  func.func @transform_2(%arg0: i32, %arg1: i32, %arg2: memref<2xi32, #tpu.memory_space<smem>>) -> (i32, i32, i32) {
    %c0_i32 = arith.constant 0 : i32
    %c0_i32_0 = arith.constant 0 : i32
    return %arg0, %c0_i32, %arg1 : i32, i32, i32
  }
  func.func @transform_3(%arg0: i32, %arg1: i32, %arg2: memref<2xi32, #tpu.memory_space<smem>>) -> (i32, i32, i32) {
    %c0_i32 = arith.constant 0 : i32
    %c0_i32_0 = arith.constant 0 : i32
    return %arg0, %c0_i32, %arg1 : i32, i32, i32
  }
}

</mosaic_0001>

<bundles_post_ra>
// kernel: tpu_custom_call.1
= control target key start
LH: loop header
LB: loop body
LE: loop exit
PB: predicated region body
PF: predicated region fallthrough
CT: control target
= control target key end

     0   :  { %s642_s15 = smov [#allocation3]   ;;  %s833_s0 = inlined_call_operand.hbm [shape: s32[2], index: 0, kind: input, shape index: {}]   ;;  %s834_s1 = inlined_call_operand.hbm [shape: f32[2,8,32], index: 1, kind: input, shape index: {}]   ;;  %s835_s2 = inlined_call_operand.vmem [shape: f32[2,1,32], index: 2, kind: input, shape index: {}]   ;;  %s836_s3 = inlined_call_operand.vmem [shape: f32[2,1,32], index: 3, kind: input, shape index: {}]   ;;  %s837_s4 = inlined_call_operand.hbm [shape: f32[2,8,32], index: 4, kind: output, shape index: {}]  }
   0x1   :  { %10 = dma.hbm_to_smem %s833_s0, 16, %s642_s15, [#allocation2] }
   0x2   :  { %608 = dma.done.wait [#allocation2], 16 }
   0x3   :  { %609 = vsyncadd [#allocation2], 4294967280 }
   0x4   :  { %12 = sfence }
   0x5   :  { %13 = vsyncpa [#allocation5], 0 }
   0x6   :  { %15 = vsyncpa [#allocation5 + $0x1], 0 }
   0x7   :  { %16 = vsyncpa [#allocation6], 0 }
   0x8   :  { %18 = vsyncpa [#allocation6 + $0x1], 0  ;;  %s673_s18 = smov 0   ;;  %s675_s19 = smov 0  }
   0x9   :  { %s677_s20 = smov 0   ;;  %s679_s21 = smov 0  }
   0xa   :  { %s681_s22 = smov 0   ;;  %s683_s23 = smov 0  }
   0xb LB: > { %s436_s0 = sadd.s32 4294967295, %s640_s23   ;;  %s437_s24 = sadd.s32 4294967294, %s640_s23   ;;  %s640_s23 = sphi %s683_s23, %s24_s23   ;;  %s636_s22 = sphi %s681_s22, %s849_s22   ;;  %s632_s21 = sphi %s679_s21, %s848_s21   ;;  %s628_s20 = sphi %s677_s20, %s847_s20   ;;  %s624_s19 = sphi %s675_s19, %s846_s19   ;;  %s620_s18 = sphi %s673_s18, %s845_s18  }
   0xc   : > { %s36_s25 = sadd.s32 1, %s636_s22  ;;  %s45_s26 = sadd.s32 1, %s628_s20 }
   0xd   : > { %p38_p0 = scmp.ge.s32.totalorder %s36_s25, 2  ;;  %p52_p1 = scmp.ne.s32.totalorder %s628_s20, %s624_s19 }
   0xe   : > { %p53_p2 = scmp.eq.s32.totalorder %s640_s23, 0  ;;  %p58_p3 = scmp.ne.s32.totalorder %s624_s19, %s620_s18 }
   0xf   : > { %s851_s25 = smov (%p38_p0, %s36_s25), 0  ;;  %p59_p5 = scmp.eq.s32.totalorder %s436_s0, 0 }
  0x10   : > { %p714_p4 = por %p53_p2, %p52_p1  ;;  %s40_s28 = ssub.s32 %s636_s22, %s851_s25 }
  0x11   : > { %p140_p6 = scmp.eq.s32.totalorder %s436_s0, 1  ;;  %p43_p7 = scmp.eq.s32.totalorder %s40_s28, 0 }
  0x12   : > { %p720_p8 = por %p59_p5, %p58_p3  ;;  %p146_p10 = scmp.eq.s32.totalorder %s437_s24, 1 }
  0x13   : > { %p724_p9 = por %p140_p6, %p52_p1  ;;  %p465_p13 = scmp.lt.s32.totalorder %s640_s23, 2 }
  0x14   : > { %s729_s5 = scalar_select %p43_p7, %s628_s20, %s45_s26  }
  0x15   : > { %p731_p11 = por %p146_p10, %p58_p3  ;;  %s166_s7 = sand.u32 1, %s628_s20  }
  0x16   : > { %s440_s8 = sshll.u32 %s166_s7, 3  ;;  %s441_s9 = sshll.u32 %s636_s22, 7 }
  0x17   : > { %s841_s6 = scalar_select %p731_p11, 1, 0 }
  0x18   : > { %s176_s12 = scalar_lea.hbm %s834_s1, %s441_s9  ;;  %s170_s13 = scalar_lea.vmem [#allocation4], %s440_s8 }
  0x19   : > { %s178_s14 = sshll.u32 %s170_s13, 4  ;;  %p744_p0 = pnand %p465_p13, %p714_p4  ;;  %s179_s14 = int_to_ptr.vmem [resolvable:$true] %s178_s14 }
  0x1a   : > { %p442_p1 = scmp.ge.s32.totalorder %s640_s23, 1  ;;  %p201_p2 = scmp.lt.s32.totalorder %s640_s23, 3 }
  0x1b   : > { %s167_s16 = scalar_lea.sflag [#allocation5], %s166_s7  ;;  %p532_p3 = pneg %p744_p0 }
  0x1c   : > { %s543_s17 = scalar_lea.vmem %s179_s14, 128  ;;  %s643_s0 = smov [#allocation4]  }
  0x1d   : > { %p544_p5 = scmp.ne.s32.totalorder %s179_s14, %s543_s17  ;;  %s548_s24 = sshll.u32 %s643_s0, 4  ;;  %s549_s24 = int_to_ptr.vmem [resolvable:$false] %s548_s24 }
  0x1e   : > { %s550_s26 = scalar_lea.vmem %s549_s24, 256  ;;  %p551_p10 = scmp.lt.s32.totalorder %s179_s14, %s549_s24 }
  0x1f   : > { %p546_p6 = pnand %p544_p5, %p532_p3  ;;  %p552_p12 = scmp.lt.s32.totalorder %s550_s26, %s543_s17 }
  0x21   : > { %p547_p7 = pneg %p546_p6  ;;  %p553_p4 = por %p552_p12, %p551_p10 }
  0x23   : > { %p554_p13 = pnand %p553_p4, %p547_p7 }
  0x25   : > { %557 = shalt.err (!%p554_p13)
}
  0x26   : > { %460 = dma.hbm_to_vmem [thread:$0]  (!%p744_p0), %s176_s12, 128, %s179_s14, %s167_s16  }
  0x27   : > { %p202_p11 = pnand %p442_p1, %p201_p2 }
  0x28   : > { %s759_s27 = sand.u32 (!%p202_p11), 1, %s624_s19  }
  0x29   : > { %205 = sbr.rel (%p202_p11) target bundleno = 196 (0xc4), region = 32  ;;  %s443_s28 = sshll.u32 (!%p202_p11), %s759_s27, 3 }
  0x2a   : > { %s208_s7 = scalar_lea.sflag (!%p202_p11), [#allocation5], %s759_s27  ;;  %s211_s8 = scalar_lea.vmem (!%p202_p11), [#allocation4], %s443_s28 }
  0x2e   : > { %611 = dma.done.wait (%p720_p8), %s208_s7, 128  }
  0x2f   : > { %613 = vsyncadd (%p720_p8), %s208_s7, 4294967168  ;;  %s770_s9 = sld [smem:[#allocation3 + %s632_s21]]  ;;  %v258_v2 = vld [vmem:[%s211_s8] sm:$0xff]  ;;  %vm264_vm0 = vcmask 261120   ;;  %p246_p8 = scmp.lt.s32.totalorder %s632_s21, 1  ;;  %v311_v28 = vlaneseq }
  0x30   : > { %v265_v3 = vsel %vm264_vm0, %v258_v2, 0.0  ;;  %s448_s0 = sshll.u32 %s632_s21, 7  ;;  %s245_s24 = scalar_lea.vmem [#allocation7], %s443_s28 }
  0x31   : > { %v266_v4 = vrot.slane %v265_v3, 4  ;;  %s247_s11 = scalar_select %p246_p8, %s632_s21, 1  ;;  %v312_v31 = vshrl.u32 %v311_v28, 7 }
  0x32   : > { %s332_s26 = sshll.u32 %s245_s24, 4  ;;  %s644_s21 = smov [#allocation7]   ;;  %s333_s26 = int_to_ptr.vmem [resolvable:$true] %s332_s26 }
  0x33   : > { %v267_v5 = vadd.f32 %v266_v4, %v265_v3  ;;  %s257_s14 = scalar_lea.vmem %s836_s3, %s247_s11  ;;  %s251_s17 = scalar_lea.vmem %s835_s2, %s247_s11 }
  0x34   : > { %v445_v30 = vld [vmem:[%s257_s14] ss:$0 sm:$0xff]  ;;  %s558_s11 = scalar_lea.vmem %s333_s26, 128  ;;  %s562_s28 = sshll.u32 %s644_s21, 4  ;;  %s563_s28 = int_to_ptr.vmem [resolvable:$false] %s562_s28 }
  0x35   : > { %s260_s10 = scvt.s32.f32 %s770_s9  ;;  %v268_v6 = vrot.slane %v267_v5, 2  ;;  %v313_v33 = vstv %s770_s9  ;;  %v446_v34 = vld [vmem:[%s251_s17] ss:$0 sm:$0xff]  ;;  %p559_p11 = scmp.ne.s32.totalorder %s333_s26, %s558_s11 }
  0x36   : > { %vm314_vm3 = vcmp.ge.s32.totalorder %v312_v31, %v313_v33  ;;  %s564_s9 = scalar_lea.vmem %s563_s28, 256  ;;  %p565_p1 = scmp.lt.s32.totalorder %s333_s26, %s563_s28 }
  0x37   : > { %v261_v0 = vstv %s260_s10  ;;  %v269_v7 = vadd.f32 %v268_v6, %v267_v5  ;;  %s790_s10 = scalar_lea.hbm %s837_s4, %s448_s0  ;;  %p560_p12 = pnand %p559_p11, %p724_p9 }
  0x38   : > { %516 = vrcp.f32 %v261_v0  ;;  %p566_p2 = scmp.lt.s32.totalorder %s564_s9, %s558_s11 }
  0x39   : > { %v270_v8 = vrot.slane %v269_v7, 1  ;;  %p561_p0 = pneg %p560_p12 }
  0x3a   : > { %p567_p3 = por %p566_p2, %p565_p1 }
  0x3b   : > { %v271_v9 = vadd.f32 %v270_v8, %v269_v7 }
  0x3c   : > { %p568_p5 = pnand %p567_p3, %p561_p0 }
  0x45   : > { %v517_v1 = vpop.eup %516 }
  0x46   : > { %451 = vpush %v517_v1 }
  0x77   : > { %s452_s29 = spop %451 }
  0x78   : > { %v272_v10 = vstv %s452_s29  ;;  %s318_s29 = scalar_lea.sflag [#allocation6], %s759_s27 }
  0x79   : > { %v273_v11 = vmul.f32 %v272_v10, %v271_v9 }
  0x7b   : > { %v274_v12 = vsub.f32 %v258_v2, %v273_v11 }
  0x7d   : > { %v275_v13 = vmul.f32 %v274_v12, %v274_v12 }
  0x7f   : > { %v276_v14 = vsel %vm264_vm0, %v275_v13, 0.0 }
  0x80   : > { %v277_v15 = vrot.slane %v276_v14, 4 }
  0x82   : > { %v278_v16 = vadd.f32 %v277_v15, %v276_v14 }
  0x84   : > { %v279_v17 = vrot.slane %v278_v16, 2 }
  0x86   : > { %v280_v18 = vadd.f32 %v279_v17, %v278_v16 }
  0x88   : > { %v281_v19 = vrot.slane %v280_v18, 1 }
  0x8a   : > { %v282_v20 = vadd.f32 %v281_v19, %v280_v18 }
  0x8c   : > { %v283_v21 = vmul.f32 %v282_v20, %v272_v10 }
  0x8e   : > { %v284_v22 = vadd.f32 1e-08, %v283_v21 }
  0x90   : > { %518 = vrsqrt.f32 %v284_v22  ;;  %vm287_vm1 = vcmp.eq.f32.partialorder %v284_v22, inf  ;;  %v290_v25 = vand.u32 2147483648, %v284_v22  ;;  %vm289_vm2 = vcmp.eq.f32.partialorder %v284_v22, 0.0 }
  0x9d   : > { %v519_v23 = vpop.eup %518 }
  0x9e   : > { %v286_v24 = vmul.f32 %v519_v23, %v284_v22 }
  0xa0   : > { %v288_v26 = vsel %vm287_vm1, %v284_v22, %v286_v24 }
  0xa1   : > { %v291_v27 = vsel %vm289_vm2, %v290_v25, %v288_v26 }
  0xa2   : > { %520 = vrcp.f32 %v291_v27 }
  0xaf   : > { %v521_v29 = vpop.eup %520 }
  0xb0   : > { %v294_v32 = vmul.f32 %v521_v29, %v274_v12 }
  0xb2   : > { %v302_v35 = vmul.f32 %v445_v30, %v294_v32 }
  0xb4   : > { %v310_v36 = vadd.f32 %v446_v34, %v302_v35 }
  0xb6   : > { %v315_v37 = vsel %vm314_vm3, 0.0, %v310_v36 }
  0xb7   : > { %316 = vst.msk [vmem:[%s245_s24] sm:$0xff] %vm264_vm0, %v315_v37 }
  0xb8   : > { %571 = shalt.err (!%p568_p5)
}
  0xb9   : > { %s572_s12 = scalar_lea.hbm %s790_s10, 128  ;;  %s576_s14 = scalar_lea.hbm %s837_s4, 256 }
  0xba   : > { %p573_p6 = scmp.ne.s32.totalorder %s790_s10, %s572_s12  ;;  %p577_p4 = scmp.lt.s32.totalorder %s790_s10, %s837_s4 }
  0xbb   : > { %p578_p13 = scmp.lt.s32.totalorder %s576_s14, %s572_s12 }
  0xbc   : > { %p574_p7 = pnand %p573_p6, %p724_p9 }
  0xbd   : > { %p579_p8 = por %p578_p13, %p577_p4 }
  0xbe   : > { %p575_p10 = pneg %p574_p7 }
  0xc0   : > { %p580_p11 = pnand %p579_p8, %p575_p10 }
  0xc2   : > { %583 = shalt.err (!%p580_p11)
}
  0xc3   : > { %455 = dma.vmem_to_hbm [thread:$0]  (%p724_p9), %s333_s26, 128, %s790_s10, %s318_s29  }
  0xc4 PF: > { %s344_s17 = sand.u32 1, %s620_s18   ;;  %p843_p12 = scmp.ne.s32.totalorder %s841_s6, 0 }
  0xc5   : > { %p844_p0 = scmp.ge.s32.totalorder %s640_s23, 2  ;;  %s345_s0 = scalar_lea.sflag [#allocation6], %s344_s17 }
  0xc7   : > { %p462_p1 = pnand %p844_p0, %p843_p12 }
  0xc9   : > { %p463_p2 = pneg %p462_p1 }
  0xcb   : > { %615 = dma.done.wait (%p463_p2), %s345_s0, 128  }
  0xcc   : > { %617 = vsyncadd (%p463_p2), %s345_s0, 4294967168  ;;  %s24_s23 = sadd.s32 1, %s640_s23   ;;  %s845_s18 = smov %s624_s19 }
  0xcd   : > { %p21_p3 = scmp.ge.s32.totalorder %s24_s23, 4   ;;  %s846_s19 = smov %s628_s20 }
  0xce   : > { %s847_s20 = smov %s729_s5  ;;  %s848_s21 = smov %s636_s22 }
  0xcf   : > { %s849_s22 = smov %s851_s25  ;;  %23 = sbr.rel (!%p21_p3) target bundleno = 11 (0xb), region = 83 }
  0xd4   :  { %350 = vsyncpa [#allocation5], 1 }
  0xd5   :  { %352 = vsyncpa [#allocation5 + $0x1], 1 }
  0xd6   :  { %353 = vsyncpa [#allocation6], 1 }
  0xd7   :  { %355 = vsyncpa [#allocation6 + $0x1], 1 }

</bundles_post_ra>
